<compile_context>
chip_gen: v7x
topology: tpu7x:2x2x1
jax: 0.10.0
libtpu: 0.0.40
codegen_flags: <defaults>
</compile_context>

<pallas_src>
import jax
import jax.numpy as jnp
from jax.experimental import pallas as pl
from jax.experimental.pallas import tpu as pltpu


def _round_up(n, m):
    return (n + m - 1) // m * m


def pack_params(params, in_szes):
    """Pack the (head-fused) parameters into one padded f32 slab.

    Returns (slab, layout) with layout[name] = (row_offset, n_rows, n_cols).
    Row blocks are padded to multiples of 8 (sublane-aligned static views);
    the slab is padded to 128 columns (lane-dense single DMA).
    """
    # Fuse the mu and sigma heads into one [hidden, 2*latent] matmul.
    w_head = jnp.concatenate([params["wmu"], params["wsg"]], axis=-1)
    b_head = jnp.concatenate([params["bmu"], params["bsg"]], axis=-1)

    tensors = [
        ("w1", params["w1"]), ("b1", params["b1"]),
        ("w2", params["w2"]), ("b2", params["b2"]),
        ("w3", params["w3"]), ("b3", params["b3"]),
        ("wh", w_head), ("bh", b_head),
    ]
    slab_cols = _round_up(max(t.shape[1] for _, t in tensors), 128)

    layout = {}
    blocks = []
    row_off = 0
    for name, t in tensors:
        nr, nc = t.shape
        nr_pad = _round_up(nr, 8)
        blk = jnp.zeros((nr_pad, slab_cols), jnp.float32)
        blk = blk.at[:nr, :nc].set(t.astype(jnp.float32))
        blocks.append(blk)
        layout[name] = (row_off, nr, nc)
        row_off += nr_pad
    slab = jnp.concatenate(blocks, axis=0)
    return slab, layout


def _make_kernel(in_szes, latent_sz, L, layout):
    n_x = len(in_szes)

    def view(slab_ref, name):
        r, nr, nc = layout[name]
        return slab_ref[r:r + nr, :nc]        # static slice: zero-cost view

    def kernel(*refs):
        x_refs = refs[:n_x]
        slab_ref = refs[n_x]
        eps_ref = refs[n_x + 1]
        out_ref = refs[n_x + 2]

        # Layer 1: fused "concat(X) @ w1" as a sum of per-input partial
        # matmuls against static row-slices of w1 (no wrapper concat).
        r1, _, nc1 = layout["w1"]
        h = view(slab_ref, "b1")
        off = 0
        for i in range(n_x):
            w1_i = slab_ref[r1 + off:r1 + off + in_szes[i], :nc1]
            h = h + jnp.dot(x_refs[i][...], w1_i,
                            preferred_element_type=jnp.float32)
            off += in_szes[i]
        h = jnp.tanh(h)

        # Layers 2 & 3.
        h = jnp.tanh(jnp.dot(h, view(slab_ref, "w2"),
                             preferred_element_type=jnp.float32)
                     + view(slab_ref, "b2"))
        h = jnp.tanh(jnp.dot(h, view(slab_ref, "w3"),
                             preferred_element_type=jnp.float32)
                     + view(slab_ref, "b3"))

        # Fused mu|sigma head: one matmul, split the columns.
        head = (jnp.dot(h, view(slab_ref, "wh"),
                        preferred_element_type=jnp.float32)
                + view(slab_ref, "bh"))
        mu = head[:, :latent_sz]
        std = jnp.logaddexp(head[:, latent_sz:2 * latent_sz], 0.0)  # softplus

        # Pack [mu | std | z_0 | ... | z_{L-1}] into one lane-dense store.
        pieces = [mu, std]
        for l in range(L):
            pieces.append(mu + std * eps_ref[l])
        out_ref[...] = jnp.concatenate(pieces, axis=-1)

    return kernel


def encoder_forward(x_list, slab, layout, eps, *, in_szes, latent_sz):
    """x_list: list of [B, in_szes[i]] arrays. eps: [L, B, latent]."""
    B = x_list[0].shape[0]
    L = eps.shape[0]

    kernel = _make_kernel(in_szes, latent_sz, L, layout)
    vmem = pl.BlockSpec(memory_space=pltpu.MemorySpace.VMEM)

    packed = pl.pallas_call(
        kernel,
        out_shape=jax.ShapeDtypeStruct((B, (L + 2) * latent_sz), jnp.float32),
        in_specs=[vmem] * (len(x_list) + 2),
        out_specs=vmem,
    )(*x_list, slab, eps)

    # Free wrapper-side split of the packed output slab.
    mu = packed[:, :latent_sz]
    std = packed[:, latent_sz:2 * latent_sz]
    z = packed[:, 2 * latent_sz:].reshape(B, L, latent_sz).transpose(1, 0, 2)
    return {"z": z, "mu_post": mu, "std_post": std}


def init_params(key, in_szes, intermediate_sz, hidden_sz, latent_sz):
    total_sz = sum(in_szes)
    ks = jax.random.split(key, 10)

    def lin(kw, kb, fan_in, fan_out):
        bound = 1.0 / jnp.sqrt(fan_in)
        w = jax.random.uniform(kw, (fan_in, fan_out), jnp.float32, -bound, bound)
        b = jax.random.uniform(kb, (1, fan_out), jnp.float32, -bound, bound)
        return w, b

    w1, b1 = lin(ks[0], ks[1], total_sz, intermediate_sz)
    w2, b2 = lin(ks[2], ks[3], intermediate_sz, intermediate_sz)
    w3, b3 = lin(ks[4], ks[5], intermediate_sz, hidden_sz)
    wmu, bmu = lin(ks[6], ks[7], hidden_sz, latent_sz)
    wsg, bsg = lin(ks[8], ks[9], hidden_sz, latent_sz)
    return dict(w1=w1, b1=b1, w2=w2, b2=b2, w3=w3, b3=b3,
                wmu=wmu, bmu=bmu, wsg=wsg, bsg=bsg)


if __name__ == "__main__":
    # Module hyperparameters (small, consistent with the forward pass)
    in_szes = [16, 16]
    intermediate_sz = 32
    hidden_sz = 32
    latent_sz = 16
    L = 3
    B = 8

    key = jax.random.PRNGKey(0)
    k_p, k_x1, k_x2, k_eps = jax.random.split(key, 4)

    params = init_params(k_p, in_szes, intermediate_sz, hidden_sz, latent_sz)
    slab, layout = pack_params(params, in_szes)

    x_list = [
        jax.random.normal(k_x1, (B, in_szes[0]), jnp.float32),
        jax.random.normal(k_x2, (B, in_szes[1]), jnp.float32),
    ]
    # eps for the L reparameterization draws (torch.randn_like equivalent),
    # generated deterministically in the wrapper and consumed in-kernel.
    eps = jax.random.normal(k_eps, (L, B, latent_sz), jnp.float32)

    out = encoder_forward(x_list, slab, layout, eps,
                          in_szes=in_szes, latent_sz=latent_sz)
    jax.block_until_ready(out)

    # sanity: reference in plain JAX (original un-fused formulation)
    xc = jnp.concatenate(x_list, axis=-1)
    h = jnp.tanh(xc @ params["w1"] + params["b1"])
    h = jnp.tanh(h @ params["w2"] + params["b2"])
    h = jnp.tanh(h @ params["w3"] + params["b3"])
    mu_ref = h @ params["wmu"] + params["bmu"]
    std_ref = jax.nn.softplus(h @ params["wsg"] + params["bsg"])
    z_ref = mu_ref[None] + std_ref[None] * eps

    assert out["z"].shape == (L, B, latent_sz)
    assert out["mu_post"].shape == (B, latent_sz)
    assert out["std_post"].shape == (B, latent_sz)
    assert jnp.allclose(out["mu_post"], mu_ref, atol=1e-5)
    assert jnp.allclose(out["std_post"], std_ref, atol=1e-5)
    assert jnp.allclose(out["z"], z_ref, atol=1e-5)

    print("KERNEL_OK")
</pallas_src>

<mosaic_0001>
module attributes {stable_mosaic.version = 11 : i64} {
  func.func @kernel(%arg0: memref<8x16xf32, #tpu.memory_space<vmem>>, %arg1: memref<8x16xf32, #tpu.memory_space<vmem>>, %arg2: memref<160x128xf32, #tpu.memory_space<vmem>>, %arg3: memref<3x8x16xf32, #tpu.memory_space<vmem>>, %arg4: memref<8x80xf32, #tpu.memory_space<vmem>>) attributes {dimension_semantics = [], scalar_prefetch = 0 : i64, scratch_operands = 0 : i64, tpu.core_type = #tpu.core_type<tc>} {
    %c32 = arith.constant 32 : index
    %c0 = arith.constant 0 : index
    %0 = vector.load %arg2[%c32, %c0] : memref<160x128xf32, #tpu.memory_space<vmem>>, vector<1x32xf32>
    %c0_0 = arith.constant 0 : index
    %c0_1 = arith.constant 0 : index
    %1 = vector.load %arg2[%c0_0, %c0_1] : memref<160x128xf32, #tpu.memory_space<vmem>>, vector<16x32xf32>
    %c0_2 = arith.constant 0 : index
    %c0_3 = arith.constant 0 : index
    %2 = vector.load %arg0[%c0_2, %c0_3] : memref<8x16xf32, #tpu.memory_space<vmem>>, vector<8x16xf32>
    %cst = arith.constant dense<0.000000e+00> : vector<8x32xf32>
    %3 = tpu.matmul %2, %1, %cst {dimension_numbers = #tpu.dot_dimension_numbers<[1], [0], [0], [1], [0, 0, 1, 1], [], []>} : vector<8x16xf32>, vector<16x32xf32>, vector<8x32xf32> -> vector<8x32xf32>
    %4 = vector.broadcast %0 : vector<1x32xf32> to vector<8x32xf32>
    %5 = arith.addf %4, %3 : vector<8x32xf32>
    %c16 = arith.constant 16 : index
    %c0_4 = arith.constant 0 : index
    %6 = vector.load %arg2[%c16, %c0_4] : memref<160x128xf32, #tpu.memory_space<vmem>>, vector<16x32xf32>
    %c0_5 = arith.constant 0 : index
    %c0_6 = arith.constant 0 : index
    %7 = vector.load %arg1[%c0_5, %c0_6] : memref<8x16xf32, #tpu.memory_space<vmem>>, vector<8x16xf32>
    %cst_7 = arith.constant dense<0.000000e+00> : vector<8x32xf32>
    %8 = tpu.matmul %7, %6, %cst_7 {dimension_numbers = #tpu.dot_dimension_numbers<[1], [0], [0], [1], [0, 0, 1, 1], [], []>} : vector<8x16xf32>, vector<16x32xf32>, vector<8x32xf32> -> vector<8x32xf32>
    %9 = arith.addf %5, %8 : vector<8x32xf32>
    %10 = math.tanh %9 : vector<8x32xf32>
    %c40 = arith.constant 40 : index
    %c0_8 = arith.constant 0 : index
    %11 = vector.load %arg2[%c40, %c0_8] : memref<160x128xf32, #tpu.memory_space<vmem>>, vector<32x32xf32>
    %cst_9 = arith.constant dense<0.000000e+00> : vector<8x32xf32>
    %12 = tpu.matmul %10, %11, %cst_9 {dimension_numbers = #tpu.dot_dimension_numbers<[1], [0], [0], [1], [0, 0, 1, 1], [], []>} : vector<8x32xf32>, vector<32x32xf32>, vector<8x32xf32> -> vector<8x32xf32>
    %c72 = arith.constant 72 : index
    %c0_10 = arith.constant 0 : index
    %13 = vector.load %arg2[%c72, %c0_10] : memref<160x128xf32, #tpu.memory_space<vmem>>, vector<1x32xf32>
    %14 = vector.broadcast %13 : vector<1x32xf32> to vector<8x32xf32>
    %15 = arith.addf %12, %14 : vector<8x32xf32>
    %16 = math.tanh %15 : vector<8x32xf32>
    %c80 = arith.constant 80 : index
    %c0_11 = arith.constant 0 : index
    %17 = vector.load %arg2[%c80, %c0_11] : memref<160x128xf32, #tpu.memory_space<vmem>>, vector<32x32xf32>
    %cst_12 = arith.constant dense<0.000000e+00> : vector<8x32xf32>
    %18 = tpu.matmul %16, %17, %cst_12 {dimension_numbers = #tpu.dot_dimension_numbers<[1], [0], [0], [1], [0, 0, 1, 1], [], []>} : vector<8x32xf32>, vector<32x32xf32>, vector<8x32xf32> -> vector<8x32xf32>
    %c112 = arith.constant 112 : index
    %c0_13 = arith.constant 0 : index
    %19 = vector.load %arg2[%c112, %c0_13] : memref<160x128xf32, #tpu.memory_space<vmem>>, vector<1x32xf32>
    %20 = vector.broadcast %19 : vector<1x32xf32> to vector<8x32xf32>
    %21 = arith.addf %18, %20 : vector<8x32xf32>
    %22 = math.tanh %21 : vector<8x32xf32>
    %c120 = arith.constant 120 : index
    %c0_14 = arith.constant 0 : index
    %23 = vector.load %arg2[%c120, %c0_14] : memref<160x128xf32, #tpu.memory_space<vmem>>, vector<32x32xf32>
    %cst_15 = arith.constant dense<0.000000e+00> : vector<8x32xf32>
    %24 = tpu.matmul %22, %23, %cst_15 {dimension_numbers = #tpu.dot_dimension_numbers<[1], [0], [0], [1], [0, 0, 1, 1], [], []>} : vector<8x32xf32>, vector<32x32xf32>, vector<8x32xf32> -> vector<8x32xf32>
    %c152 = arith.constant 152 : index
    %c0_16 = arith.constant 0 : index
    %25 = vector.load %arg2[%c152, %c0_16] : memref<160x128xf32, #tpu.memory_space<vmem>>, vector<1x32xf32>
    %26 = vector.broadcast %25 : vector<1x32xf32> to vector<8x32xf32>
    %27 = arith.addf %24, %26 : vector<8x32xf32>
    %28 = vector.extract_strided_slice %27 {offsets = [0, 0], sizes = [8, 16], strides = [1, 1]} : vector<8x32xf32> to vector<8x16xf32>
    %29 = vector.extract_strided_slice %27 {offsets = [0, 16], sizes = [8, 16], strides = [1, 1]} : vector<8x32xf32> to vector<8x16xf32>
    %cst_17 = arith.constant 0.000000e+00 : f32
    %30 = vector.broadcast %cst_17 : f32 to vector<8x16xf32>
    %31 = arith.maximumf %29, %30 : vector<8x16xf32>
    %32 = vector.broadcast %cst_17 : f32 to vector<8x16xf32>
    %33 = arith.subf %29, %32 : vector<8x16xf32>
    %34 = arith.cmpf one, %33, %33 : vector<8x16xf32>
    %35 = vector.broadcast %cst_17 : f32 to vector<8x16xf32>
    %36 = arith.addf %29, %35 : vector<8x16xf32>
    %37 = math.absf %33 : vector<8x16xf32>
    %cst_18 = arith.constant 0.000000e+00 : f32
    %38 = vector.broadcast %cst_18 : f32 to vector<8x16xf32>
    %39 = arith.subf %38, %37 : vector<8x16xf32>
    %40 = math.exp %39 : vector<8x16xf32>
    %41 = math.log1p %40 : vector<8x16xf32>
    %42 = arith.addf %31, %41 : vector<8x16xf32>
    %43 = arith.select %34, %36, %42 : vector<8x16xi1>, vector<8x16xf32>
    %c0_19 = arith.constant 0 : index
    %c0_20 = arith.constant 0 : index
    %c0_21 = arith.constant 0 : index
    %44 = vector.load %arg3[%c0_19, %c0_20, %c0_21] : memref<3x8x16xf32, #tpu.memory_space<vmem>>, vector<1x8x16xf32>
    %45 = vector.shape_cast %44 : vector<1x8x16xf32> to vector<8x16xf32>
    %46 = arith.mulf %43, %45 : vector<8x16xf32>
    %47 = arith.addf %28, %46 : vector<8x16xf32>
    %c1 = arith.constant 1 : index
    %c0_22 = arith.constant 0 : index
    %c0_23 = arith.constant 0 : index
    %48 = vector.load %arg3[%c1, %c0_22, %c0_23] : memref<3x8x16xf32, #tpu.memory_space<vmem>>, vector<1x8x16xf32>
    %49 = vector.shape_cast %48 : vector<1x8x16xf32> to vector<8x16xf32>
    %50 = arith.mulf %43, %49 : vector<8x16xf32>
    %51 = arith.addf %28, %50 : vector<8x16xf32>
    %c2 = arith.constant 2 : index
    %c0_24 = arith.constant 0 : index
    %c0_25 = arith.constant 0 : index
    %52 = vector.load %arg3[%c2, %c0_24, %c0_25] : memref<3x8x16xf32, #tpu.memory_space<vmem>>, vector<1x8x16xf32>
    %53 = vector.shape_cast %52 : vector<1x8x16xf32> to vector<8x16xf32>
    %54 = arith.mulf %43, %53 : vector<8x16xf32>
    %55 = arith.addf %28, %54 : vector<8x16xf32>
    %56 = tpu.concatenate %28, %43, %47, %51, %55 in 1 : vector<8x16xf32>, vector<8x16xf32>, vector<8x16xf32>, vector<8x16xf32>, vector<8x16xf32> -> vector<8x80xf32>
    %c0_26 = arith.constant 0 : index
    %c0_27 = arith.constant 0 : index
    %57 = vector.load %arg4[%c0_26, %c0_27] : memref<8x80xf32, #tpu.memory_space<vmem>>, vector<8x80xf32>
    tpu.vector_store %arg4[%c0_26, %c0_27], %56 {strides = array<i32>} : memref<8x80xf32, #tpu.memory_space<vmem>>, vector<8x80xf32>,
    return
  }
}

</mosaic_0001>

<bundles_post_ra>
// kernel: tpu_custom_call.1
= control target key start
LH: loop header
LB: loop body
LE: loop exit
PB: predicated region body
PF: predicated region fallthrough
CT: control target
= control target key end

     0   :  { %9 = vsyncpa [#allocation3], 0  ;;  %s936_s0 = inlined_call_operand.hbm [shape: f32[8,16], index: 0, kind: input, shape index: {}]   ;;  %s937_s1 = inlined_call_operand.hbm [shape: f32[8,16], index: 1, kind: input, shape index: {}]   ;;  %s938_s2 = inlined_call_operand.hbm [shape: f32[160,128], index: 2, kind: input, shape index: {}]   ;;  %s939_s3 = inlined_call_operand.hbm [shape: f32[3,8,16], index: 3, kind: input, shape index: {}]   ;;  %s940_s4 = inlined_call_operand.hbm [shape: f32[8,80], index: 4, kind: output, shape index: {}]  }
   0x1   :  { %10 = vsyncpa [#allocation6], 0 }
   0x2   :  { %11 = vsyncpa [#allocation9], 0 }
   0x3   :  { %12 = vsyncpa [#allocation4], 0  ;;  %s816_s15 = smov [#allocation5]   ;;  %s817_s17 = smov [#allocation2]  }
   0x4   :  { %s29_s16 = sshll.u32 %s816_s15, 4  ;;  %s19_s18 = sshll.u32 %s817_s17, 4  ;;  %s30_s16 = int_to_ptr.vmem [resolvable:$true] %s29_s16  ;;  %s20_s18 = int_to_ptr.vmem [resolvable:$true] %s19_s18 }
   0x5   :  { %s698_s21 = scalar_lea.hbm %s937_s1, 128 }
   0x6   :  { %p699_p0 = scmp.ne.s32.totalorder %s937_s1, %s698_s21  ;;  %p702_p1 = scmp.lt.u32.totalorder %s698_s21, %s937_s1 }
   0x8   :  { %p704_p2 = pnand %p702_p1, %p699_p0 }
   0xa   :  { %707 = shalt.err (!%p704_p2)
}
   0xb   :  { %s708_s26 = scalar_lea.vmem %s30_s16, 128  ;;  %p713_p4 = scmp.lt.s32.totalorder %s30_s16, %s30_s16 }
   0xc   :  { %p709_p3 = scmp.ne.s32.totalorder %s30_s16, %s708_s26  ;;  %p714_p5 = scmp.lt.s32.totalorder %s708_s26, %s708_s26 }
   0xe   :  { %p715_p6 = por %p714_p5, %p713_p4 }
  0x10   :  { %p716_p7 = pnand %p715_p6, %p709_p3 }
  0x12   :  { %719 = shalt.err (!%p716_p7)
}
  0x13   :  { %32 = dma.hbm_to_vmem [thread:$0]  %s937_s1, 128, %s30_s16, [#allocation6]  }
  0x14   :  { %s720_s5 = scalar_lea.hbm %s936_s0, 128 }
  0x15   :  { %p721_p8 = scmp.ne.s32.totalorder %s936_s0, %s720_s5  ;;  %p724_p9 = scmp.lt.u32.totalorder %s720_s5, %s936_s0 }
  0x17   :  { %p726_p10 = pnand %p724_p9, %p721_p8 }
  0x19   :  { %729 = shalt.err (!%p726_p10)
}
  0x1a   :  { %s730_s10 = scalar_lea.vmem %s20_s18, 128  ;;  %p735_p12 = scmp.lt.s32.totalorder %s20_s18, %s20_s18 }
  0x1b   :  { %p731_p11 = scmp.ne.s32.totalorder %s20_s18, %s730_s10  ;;  %p736_p13 = scmp.lt.s32.totalorder %s730_s10, %s730_s10 }
  0x1d   :  { %p737_p0 = por %p736_p13, %p735_p12 }
  0x1f   :  { %p738_p1 = pnand %p737_p0, %p731_p11 }
  0x21   :  { %741 = shalt.err (!%p738_p1)
}
  0x22   :  { %22 = dma.hbm_to_vmem [thread:$0]  %s936_s0, 128, %s20_s18, [#allocation3]  }
  0x23   :  { %s818_s12 = smov [#allocation7]   ;;  %s742_s16 = scalar_lea.hbm %s938_s2, 2560 }
  0x24   :  { %s38_s13 = sshll.u32 %s818_s12, 4  ;;  %p743_p2 = scmp.ne.s32.totalorder %s938_s2, %s742_s16  ;;  %s39_s13 = int_to_ptr.vmem [resolvable:$true] %s38_s13 }
  0x25   :  { %p746_p3 = scmp.lt.u32.totalorder %s742_s16, %s938_s2 }
  0x27   :  { %p748_p4 = pnand %p746_p3, %p743_p2 }
  0x29   :  { %751 = shalt.err (!%p748_p4)
}
  0x2a   :  { %s752_s22 = scalar_lea.vmem %s39_s13, 2560  ;;  %p757_p6 = scmp.lt.s32.totalorder %s39_s13, %s39_s13 }
  0x2b   :  { %p753_p5 = scmp.ne.s32.totalorder %s39_s13, %s752_s22  ;;  %p758_p7 = scmp.lt.s32.totalorder %s752_s22, %s752_s22 }
  0x2d   :  { %p759_p8 = por %p758_p7, %p757_p6 }
  0x2f   :  { %p760_p9 = pnand %p759_p8, %p753_p5 }
  0x31   :  { %763 = shalt.err (!%p760_p9)
}
  0x32   :  { %s819_s0 = smov 128   ;;  %s820_s18 = smov 8  }
  0x33   :  { %44 = dma.hbm_to_vmem [thread:$0]  %s938_s2, 2560, %s39_s13, [#allocation6], %s819_s0, %s819_s0, %s820_s18  }
  0x34   :  { %s821_s25 = smov [#allocation8]   ;;  %s764_s29 = scalar_lea.hbm %s939_s3, 384 }
  0x35   :  { %s50_s26 = sshll.u32 %s821_s25, 4  ;;  %p765_p10 = scmp.ne.s32.totalorder %s939_s3, %s764_s29  ;;  %s51_s26 = int_to_ptr.vmem [resolvable:$true] %s50_s26 }
  0x36   :  { %p768_p11 = scmp.lt.u32.totalorder %s764_s29, %s939_s3 }
  0x38   :  { %p770_p12 = pnand %p768_p11, %p765_p10 }
  0x3a   :  { %773 = shalt.err (!%p770_p12)
}
  0x3b   :  { %s774_s8 = scalar_lea.vmem %s51_s26, 384  ;;  %p779_p0 = scmp.lt.s32.totalorder %s51_s26, %s51_s26 }
  0x3c   :  { %p775_p13 = scmp.ne.s32.totalorder %s51_s26, %s774_s8  ;;  %p780_p1 = scmp.lt.s32.totalorder %s774_s8, %s774_s8 }
  0x3e   :  { %p781_p2 = por %p780_p1, %p779_p0 }
  0x40   :  { %p782_p3 = pnand %p781_p2, %p775_p13 }
  0x42   :  { %785 = shalt.err (!%p782_p3)
}
  0x43   :  { %56 = dma.hbm_to_vmem [thread:$0]  %s939_s3, 384, %s51_s26, [#allocation9], %s819_s0, %s819_s0, %s820_s18  }
  0x44   :  { %808 = dma.done.wait [#allocation3], 128  }
  0x45   :  { %809 = vsyncadd [#allocation3], 4294967168 }
  0x46   :  { %810 = dma.done.wait [#allocation6], 2688  }
  0x47   :  { %811 = vsyncadd [#allocation6], 4294964608 }
  0x48   :  { %812 = dma.done.wait [#allocation9], 384  }
  0x49   :  { %813 = vsyncadd [#allocation9], 4294966912  ;;  %v822_v0 = vmov 0.0|0.0   ;;  %vm823_vm0 = vmmov 0   ;;  %v824_v1 = vmov 0.0   ;;  %v70_v2 = vld [vmem:[#allocation7] sm:$0xff] }
  0x4a   :  { %646 = vmatprep.subr.bf16.mxu0 %v822_v0  ;;  %603 = vmatprep.mubr.msk.f32.mxu0 %vm823_vm0, %v824_v1  ;;  %v71_v3 = vld [vmem:[#allocation7 + $0x8] sm:$0xff]  ;;  %v152_v5 = vld [vmem:[#allocation7 + $0x10] sm:$0xff]  ;;  %v153_v6 = vld [vmem:[#allocation7 + $0x18] sm:$0xff]  ;;  %vm73_vm1 = vcmask 130048   ;;  %vm239_vm2 = vcmask 261120   ;;  %s825_s3 = smov 16  }
  0x4b   :  { %652 = vmatprep.subr.bf16.mxu1 %v822_v0  ;;  %621 = vmatprep.mubr.msk.f32.mxu1 %vm823_vm0, %v824_v1  ;;  %v647_v4 = vpack.c.bf16 %v71_v3, %v70_v2  ;;  %v72_v7 = vld [vmem:[#allocation2] sm:$0xff]  ;;  %v650_v8 = vpack.c.bf16 %v153_v6, %v152_v5  ;;  %v154_v9 = vld [vmem:[#allocation5] sm:$0xff]  ;;  %v230_v10 = vld [vmem:[#allocation7 + $0x28] sm:$0xff]  ;;  %s826_s10 = smov 112   ;;  %s827_s1 = smov 48   ;;  %vm546_vm5 = vcmask 392192  }
  0x4c   :  { %v231_v11 = vld [vmem:[#allocation7 + $0x30] sm:$0xff]  ;;  %v232_v12 = vld [vmem:[#allocation7 + $0x38] sm:$0xff]  ;;  %v233_v14 = vld [vmem:[#allocation7 + $0x40] sm:$0xff]  ;;  %s828_s11 = smov 32   ;;  %s829_s12 = smov 64   ;;  %vm548_vm6 = vcmask 523264  }
  0x4d   :  { %648 = vmatpush3.bf16.msra.mxu0 %v647_v4  ;;  %v653_v13 = vpack.c.bf16 %v231_v11, %v230_v10  ;;  %v656_v15 = vpack.c.bf16 %v233_v14, %v232_v12  ;;  %v570_v16 = vld [vmem:[#allocation7 + $0x20] ss:$0 sm:$0xff]  ;;  %v314_v21 = vld [vmem:[#allocation7 + $0x50] sm:$0xff]  ;;  %v315_v22 = vld [vmem:[#allocation7 + $0x58] sm:$0xff]  ;;  %s830_s13 = smov [#allocation10]   ;;  %vm550_vm7 = vcmask 654336  }
  0x4e   :  { %649 = vmatprep.subr.bf16.mxu0 %v822_v0  ;;  %v316_v23 = vld [vmem:[#allocation7 + $0x60] sm:$0xff]  ;;  %v659_v24 = vpack.c.bf16 %v315_v22, %v314_v21  ;;  %v317_v25 = vld [vmem:[#allocation7 + $0x68] sm:$0xff]  ;;  %v397_v32 = vld [vmem:[#allocation7 + $0x78] sm:$0xff]  ;;  %s558_s14 = sshll.u32 %s830_s13, 4  ;;  %s559_s14 = int_to_ptr.vmem [resolvable:$true] %s558_s14 }
  0x4f   :  { %654 = vmatpush3.bf16.msra.mxu1 %v653_v13  ;;  %v662_v26 = vpack.c.bf16 %v317_v25, %v316_v23  ;;  %v572_v27 = vld [vmem:[#allocation7 + $0x48] ss:$0 sm:$0xff]  ;;  %v398_v33 = vld [vmem:[#allocation7 + $0x80] sm:$0xff]  ;;  %v400_v36 = vld [vmem:[#allocation7 + $0x90] sm:$0xff]  ;;  %s786_s15 = scalar_lea.vmem %s559_s14, 128  ;;  %p791_p5 = scmp.lt.s32.totalorder %s559_s14, %s559_s14 }
  0x50   :  { %604 = vmatmul.mubr.msk.f32.vlgmr.msra.gmra.mrb[0].mxu0 %vm73_vm1, %v72_v7  ;;  %655 = vmatprep.subr.bf16.mxu1 %v822_v0  ;;  %v399_v34 = vld [vmem:[#allocation7 + $0x88] sm:$0xff]  ;;  %v665_v35 = vpack.c.bf16 %v398_v33, %v397_v32  ;;  %v497_v38 = vld [vmem:[#allocation8] sm:$0xff]  ;;  %v521_v39 = vld [vmem:[#allocation8 + $0x10] sm:$0xff]  ;;  %p787_p4 = scmp.ne.s32.totalorder %s559_s14, %s786_s15  ;;  %p792_p6 = scmp.lt.s32.totalorder %s786_s15, %s786_s15 }
  0x51   :  { %651 = vmatpush3.bf16.msra.mxu0 %v650_v8  ;;  %610 = vmatprep.mubr.msk.f32.mxu0 %vm823_vm0, %v824_v1  ;;  %v668_v37 = vpack.c.bf16 %v400_v36, %v399_v34  ;;  %v509_v40 = vld [vmem:[#allocation8 + $0x8] sm:$0xff]  ;;  %v574_v41 = vld [vmem:[#allocation7 + $0x70] ss:$0 sm:$0xff]  ;;  %v576_v46 = vld [vmem:[#allocation7 + $0x98] ss:$0 sm:$0xff] }
  0x52   :  { %658 = vmatprep.subr.bf16.mxu0 %v822_v0  ;;  %499 = vrot.lane.b32.xlu0 %v497_v38, %s825_s3  ;;  %p793_p7 = por %p792_p6, %p791_p5 }
  0x53   :  { %657 = vmatpush3.bf16.msra.mxu1 %v656_v15  ;;  %523 = vrot.lane.b32.xlu1 %v521_v39, %s825_s3 }
  0x54   :  { %664 = vmatprep.subr.bf16.mxu1 %v822_v0  ;;  %p794_p8 = pnand %p793_p7, %p787_p4 }
  0x56   :  { %511 = vrot.lane.b32.xlu0 %v509_v40, %s825_s3 }
  0x58   :  { %611 = vmatmul.mubr.msk.f32.vlgmr.msra.gmra.mrb[0].mxu0 %vm73_vm1, %v154_v9 }
  0x59   :  { %632 = vmatprep.mubr.msk.f32.mxu0 %vm823_vm0, %v824_v1  ;;  %660 = vmatpush3.bf16.msra.mxu0 %v659_v24 }
  0x5a   :  { %661 = vmatprep.subr.bf16.mxu0 %v822_v0 }
  0x5d   :  { %663 = vmatpush3.bf16.msra.mxu0 %v662_v26 }
  0xc4   :  { %v500_v57 = vpop.permute.xlu0 %499 }
  0xc5   :  { %v524_v5 = vpop.permute.xlu1 %523 }
 0x12b   :  { %v224_v17 = vpop.f32.mrb[0].mxu0 }
 0x12c   :  { %v670_v18 = vadd.f32 %v570_v16, %v224_v17  ;;  %v612_v19 = vpop.f32.mrb[1].mxu0 }
 0x12e   :  { %688 = vtanh.f32 %v670_v18 }
 0x138   :  { %v689_v20 = vpop.eup %688 }
 0x139   :  { %622 = vmatmul.mubr.msk.f32.vlgmr.msra.gmra.mrb[0].mxu1 %vm239_vm2, %v689_v20 }
 0x13a   :  { %643 = vmatprep.mubr.msk.f32.mxu1 %vm823_vm0, %v824_v1  ;;  %666 = vmatpush3.bf16.msra.mxu1 %v665_v35  ;;  %v512_v1 = vpop.permute.xlu0 %511 }
 0x13b   :  { %667 = vmatprep.subr.bf16.mxu1 %v822_v0 }
 0x13e   :  { %669 = vmatpush3.bf16.msra.mxu1 %v668_v37 }
 0x20c   :  { %v309_v28 = vpop.f32.mrb[0].mxu1 }
 0x20d   :  { %v310_v29 = vadd.f32 %v572_v27, %v309_v28  ;;  %v623_v30 = vpop.f32.mrb[1].mxu1 }
 0x20f   :  { %690 = vtanh.f32 %v310_v29 }
 0x219   :  { %v691_v31 = vpop.eup %690 }
 0x21a   :  { %633 = vmatmul.mubr.msk.f32.vlgmr.msra.gmra.mrb[2].mxu0 %vm239_vm2, %v691_v31 }
 0x2ed   :  { %v392_v42 = vpop.f32.mrb[2].mxu0 }
 0x2ee   :  { %v393_v43 = vadd.f32 %v574_v41, %v392_v42  ;;  %v634_v44 = vpop.f32.mrb[3].mxu0 }
 0x2f0   :  { %692 = vtanh.f32 %v393_v43 }
 0x2fa   :  { %v693_v45 = vpop.eup %692 }
 0x2fb   :  { %644 = vmatmul.mubr.msk.f32.vlgmr.msra.gmra.mrb[2].mxu1 %vm239_vm2, %v693_v45 }
 0x3ce   :  { %v475_v47 = vpop.f32.mrb[2].mxu1 }
 0x3cf   :  { %v476_v48 = vadd.f32 %v576_v46, %v475_v47  ;;  %v645_v49 = vpop.f32.mrb[3].mxu1 }
 0x3d1   :  { %v482_v50 = vand.u32 2147483647, %v476_v48  ;;  %v479_v62 = vmax.f32 %v476_v48, 0.0  ;;  %vm480_vm4 = vcmp.ne.f32.partialorder %v476_v48, %v476_v48 }
 0x3d3   :  { %v483_v51 = vsub.f32 0.0, %v482_v50 }
 0x3d5   :  { %v484_v52 = vmul.f32 1.442695, %v483_v51 }
 0x3d7   :  { %694 = vpow2.f32 %v484_v52 }
 0x3e1   :  { %v695_v53 = vpop.eup %694 }
 0x3e2   :  { %v486_v54 = vadd.f32 1.0, %v695_v53  ;;  %v489_v55 = vmul.f32 -0.5, %v695_v53  ;;  %v492_v58 = vand.u32 2147483647, %v695_v53 }
 0x3e4   :  { %696 = vlog2.f32 %v486_v54  ;;  %v490_v56 = vadd.f32 1.0, %v489_v55  ;;  %vm493_vm3 = vcmp.lt.f32.partialorder %v492_v58, 0.0004427343 }
 0x3e6   :  { %v491_v61 = vmul.f32 %v695_v53, %v490_v56 }
 0x3ee   :  { %v697_v59 = vpop.eup %696 }
 0x3ef   :  { %v488_v60 = vmul.f32 0.6931472, %v697_v59 }
 0x3f1   :  { %v494_v63 = vsel %vm493_vm3, %v491_v61, %v488_v60 }
 0x3f2   :  { %v495_v0 = vadd.f32 %v494_v63, %v479_v62 }
 0x3f4   :  { %v496_v2 = vsel %vm480_vm4, %v476_v48, %v495_v0 }
 0x3f5   :  { %v502_v3 = vmul.f32 %v500_v57, %v496_v2  ;;  %v514_v4 = vmul.f32 %v512_v1, %v496_v2  ;;  %v526_v6 = vmul.f32 %v524_v5, %v496_v2  ;;  %v544_v13 = vsel %vm73_vm1, %v476_v48, %v496_v2 }
 0x3f7   :  { %516 = vrot.lane.b32.xlu0 %v514_v4, %s826_s10  ;;  %504 = vrot.lane.b32.xlu1 %v502_v3, %s826_s10 }
 0x3fb   :  { %528 = vrot.lane.b32.xlu1 %v526_v6, %s826_s10 }
 0x469   :  { %v517_v7 = vpop.permute.xlu0 %516  ;;  %v505_v8 = vpop.permute.xlu1 %504 }
 0x46a   :  { %v519_v9 = vadd.f32 %v517_v7, %v476_v48  ;;  %v507_v10 = vadd.f32 %v505_v8, %v476_v48 }
 0x46c   :  { %537 = vrot.lane.b32.xlu1 %v519_v9, %s827_s1  ;;  %533 = vrot.lane.b32.xlu0 %v507_v10, %s828_s11 }
 0x46d   :  { %v529_v11 = vpop.permute.xlu1 %528 }
 0x46e   :  { %v531_v12 = vadd.f32 %v529_v11, %v476_v48 }
 0x470   :  { %541 = vrot.lane.b32.xlu0 %v531_v12, %s829_s12 }
 0x4de   :  { %v534_v14 = vpop.permute.xlu0 %533  ;;  %v538_v16 = vpop.permute.xlu1 %537 }
 0x4df   :  { %v545_v15 = vsel %vm239_vm2, %v544_v13, %v534_v14 }
 0x4e0   :  { %v547_v17 = vsel %vm546_vm5, %v545_v15, %v538_v16 }
 0x4e2   :  { %v542_v18 = vpop.permute.xlu0 %541 }
 0x4e3   :  { %v549_v19 = vsel %vm548_vm6, %v547_v17, %v542_v18 }
 0x4e4   :  { %551 = vst.msk [vmem:[#allocation10] sm:$0xff] %vm550_vm7, %v549_v19 }
 0x4e5   :  { %797 = shalt.err (!%p794_p8)
}
 0x4e6   :  { %s798_s19 = scalar_lea.hbm %s940_s4, 128 }
 0x4e7   :  { %p799_p9 = scmp.ne.s32.totalorder %s940_s4, %s798_s19  ;;  %p802_p10 = scmp.lt.u32.totalorder %s798_s19, %s940_s4 }
 0x4e9   :  { %p804_p11 = pnand %p802_p10, %p799_p9 }
 0x4eb   :  { %807 = shalt.err (!%p804_p11)
}
 0x4ec   :  { %561 = dma.vmem_to_hbm [thread:$0]  %s559_s14, 128, %s940_s4, [#allocation4]  }
 0x4ed   :  { %814 = dma.done.wait [#allocation4], 128  }
 0x4ee   :  { %815 = vsyncadd [#allocation4], 4294967168 }
 0x4ef   :  { %565 = vsyncpa [#allocation3], 1 }
 0x4f0   :  { %566 = vsyncpa [#allocation6], 1 }
 0x4f1   :  { %567 = vsyncpa [#allocation9], 1 }
 0x4f2   :  { %568 = vsyncpa [#allocation4], 1 }

</bundles_post_ra>
